<compile_context>
chip_gen: v5e
topology: v5e:2x2
jax: 0.10.0
libtpu: 0.0.40
codegen_flags: <defaults>
</compile_context>

<pallas_src>
import functools

import jax
import jax.numpy as jnp
from jax import lax
from jax.experimental import pallas as pl
from jax.experimental.pallas import tpu as pltpu


def _group_norm_kernel(x_ref, gamma_ref, beta_ref, o_ref, *,
                       groups_per_block, channels_per_group, eps):
    # x_ref:     (GC, HW)  with GC = groups_per_block * channels_per_group
    # gamma_ref: (GC, 1)
    # beta_ref:  (GC, 1)
    Gb = groups_per_block
    Cg = channels_per_group
    GC, HW = x_ref.shape
    inv_n = 1.0 / (Cg * HW)

    x = x_ref[...].astype(jnp.float32)                       # (GC, HW)

    # Tiny group-membership matrices (no integer division; mul/compare only).
    #   S: (Gb, GC)  sums per-channel values into per-group values
    #   U: (GC, Gb)  broadcasts per-group values back to per-channel values
    g_s = lax.broadcasted_iota(jnp.int32, (Gb, GC), 0)
    c_s = lax.broadcasted_iota(jnp.int32, (Gb, GC), 1)
    lo_s = g_s * Cg
    S = jnp.logical_and(c_s >= lo_s, c_s < lo_s + Cg).astype(jnp.float32)

    c_u = lax.broadcasted_iota(jnp.int32, (GC, Gb), 0)
    g_u = lax.broadcasted_iota(jnp.int32, (GC, Gb), 1)
    lo_u = g_u * Cg
    U = jnp.logical_and(c_u >= lo_u, c_u < lo_u + Cg).astype(jnp.float32)

    # Pass 1: per-group mean, broadcast back per-channel.
    row_sum = jnp.sum(x, axis=-1, keepdims=True)             # (GC, 1)
    mean_g = jnp.dot(S, row_sum,
                     preferred_element_type=jnp.float32) * inv_n   # (Gb, 1)
    mean_c = jnp.dot(U, mean_g,
                     preferred_element_type=jnp.float32)           # (GC, 1)

    # Pass 2: per-group biased variance (two-pass; avoids cancellation).
    d = x - mean_c
    row_ss = jnp.sum(d * d, axis=-1, keepdims=True)          # (GC, 1)
    var_g = jnp.dot(S, row_ss,
                    preferred_element_type=jnp.float32) * inv_n    # (Gb, 1)
    inv_g = lax.rsqrt(var_g + eps)                           # (Gb, 1)
    inv_c = jnp.dot(U, inv_g,
                    preferred_element_type=jnp.float32)      # (GC, 1)

    # Fused affine: out = x * a + b  (single per-element FMA).
    gamma = gamma_ref[...].astype(jnp.float32)               # (GC, 1)
    beta = beta_ref[...].astype(jnp.float32)                 # (GC, 1)
    a = gamma * inv_c
    b = beta - mean_c * a
    o_ref[...] = (x * a + b).astype(o_ref.dtype)


def group_norm(x, gamma, beta, *, num_groups=32, eps=1e-6,
               target_block_bytes=2 * 1024 * 1024):
    """GroupNorm forward, NCHW input. gamma/beta have shape (C,)."""
    N, C, H, W = x.shape
    G = num_groups
    assert C % G == 0, "channels must be divisible by num_groups"
    Cg = C // G
    HW = H * W
    itemsize = jnp.dtype(x.dtype).itemsize

    # Pack Gb whole groups per block: largest divisor of G whose slab fits the
    # target (~1-2 MiB).  This gives a sublane-dense (Gb*Cg >= 8 for typical
    # shapes) block and few, large grid steps.  For bf16 inputs the same rule
    # naturally packs >=16 sublanes when the budget allows.
    Gb = 1
    for cand in range(1, G + 1):
        if G % cand == 0 and cand * Cg * HW * itemsize <= target_block_bytes:
            Gb = cand
    n_gb = G // Gb
    GC = Gb * Cg

    x_r = x.reshape(N, n_gb, GC, HW)
    gamma_r = gamma.reshape(n_gb, GC, 1)
    beta_r = beta.reshape(n_gb, GC, 1)

    kernel = functools.partial(
        _group_norm_kernel,
        groups_per_block=Gb,
        channels_per_group=Cg,
        eps=eps,
    )

    # VMEM budget: ~2x in + 2x out (double-buffered) + params + headroom,
    # capped at 32 MiB so it stays within the v7x 64 MiB physical VMEM.
    block_bytes = GC * HW * itemsize
    vmem_limit = int(min(max(4 * block_bytes + (4 << 20), 16 << 20), 32 << 20))

    out = pl.pallas_call(
        kernel,
        out_shape=jax.ShapeDtypeStruct((N, n_gb, GC, HW), x.dtype),
        # Group-block axis outermost so gamma/beta block indices are constant
        # across the inner batch loop (Pallas elides the repeated DMAs).
        grid=(n_gb, N),
        in_specs=[
            pl.BlockSpec((None, None, GC, HW), lambda g, n: (n, g, 0, 0)),
            pl.BlockSpec((None, GC, 1), lambda g, n: (g, 0, 0)),
            pl.BlockSpec((None, GC, 1), lambda g, n: (g, 0, 0)),
        ],
        out_specs=pl.BlockSpec((None, None, GC, HW), lambda g, n: (n, g, 0, 0)),
        compiler_params=pltpu.CompilerParams(
            dimension_semantics=("parallel", "parallel"),
            vmem_limit_bytes=vmem_limit,
        ),
    )(x_r, gamma_r, beta_r)

    return out.reshape(N, C, H, W)


def group_norm_ref(x, gamma, beta, *, num_groups=32, eps=1e-6):
    """Pure-JAX reference matching torch.nn.GroupNorm semantics."""
    N, C, H, W = x.shape
    G = num_groups
    xr = x.reshape(N, G, -1).astype(jnp.float32)
    mean = jnp.mean(xr, axis=-1, keepdims=True)
    var = jnp.mean((xr - mean) ** 2, axis=-1, keepdims=True)
    xn = (xr - mean) * lax.rsqrt(var + eps)
    xn = xn.reshape(N, C, H, W)
    return (xn * gamma[None, :, None, None] + beta[None, :, None, None]).astype(x.dtype)


if __name__ == "__main__":
    # num_groups=32 requires channels divisible by 32 -> use C=64.
    N, C, H, W = 2, 64, 16, 16

    key = jax.random.PRNGKey(0)
    kx, kg, kb = jax.random.split(key, 3)

    x = jax.random.normal(kx, (N, C, H, W), dtype=jnp.float32)
    # PyTorch default init is ones/zeros; perturb so the affine path is exercised.
    gamma = 1.0 + 0.1 * jax.random.normal(kg, (C,), dtype=jnp.float32)
    beta = 0.1 * jax.random.normal(kb, (C,), dtype=jnp.float32)

    out = group_norm(x, gamma, beta, num_groups=32, eps=1e-6)
    out = jax.block_until_ready(out)

    ref = group_norm_ref(x, gamma, beta, num_groups=32, eps=1e-6)
    assert out.shape == (N, C, H, W)
    assert jnp.max(jnp.abs(out - ref)) < 1e-4, "Pallas GroupNorm mismatch vs reference"

    print("KERNEL_OK")
</pallas_src>

<mosaic_0001>
module attributes {stable_mosaic.version = 11 : i64} {
  func.func @_group_norm_kernel(%arg0: i32, %arg1: i32, %arg2: memref<1x1x64x256xf32, #tpu.memory_space<vmem>>, %arg3: memref<1x64x1xf32, #tpu.memory_space<vmem>>, %arg4: memref<1x64x1xf32, #tpu.memory_space<vmem>>, %arg5: memref<1x1x64x256xf32, #tpu.memory_space<vmem>>) attributes {dimension_semantics = [#tpu.dimension_semantics<parallel>, #tpu.dimension_semantics<parallel>], iteration_bounds = array<i64: 1, 2>, scalar_prefetch = 0 : i64, scratch_operands = 0 : i64, tpu.core_type = #tpu.core_type<tc>, window_params = [{transform_indices = @transform_0, window_bounds = array<i64: 1, 1, 64, 256>}, {transform_indices = @transform_1, window_bounds = array<i64: 1, 64, 1>}, {transform_indices = @transform_2, window_bounds = array<i64: 1, 64, 1>}, {transform_indices = @transform_3, window_bounds = array<i64: 1, 1, 64, 256>}]} {
    %c0 = arith.constant 0 : index
    %c0_0 = arith.constant 0 : index
    %c0_1 = arith.constant 0 : index
    %c0_2 = arith.constant 0 : index
    %0 = vector.load %arg2[%c0, %c0_0, %c0_1, %c0_2] : memref<1x1x64x256xf32, #tpu.memory_space<vmem>>, vector<1x1x64x256xf32>
    %1 = vector.shape_cast %0 : vector<1x1x64x256xf32> to vector<64x256xf32>
    %2 = tpu.iota {dimensions = array<i32: 0>} : vector<32x64xi32>
    %3 = tpu.iota {dimensions = array<i32: 1>} : vector<32x64xi32>
    %c2_i32 = arith.constant 2 : i32
    %4 = vector.broadcast %c2_i32 : i32 to vector<32x64xi32>
    %5 = arith.muli %2, %4 : vector<32x64xi32>
    %6 = arith.cmpi sge, %3, %5 : vector<32x64xi32>
    %c2_i32_3 = arith.constant 2 : i32
    %7 = vector.broadcast %c2_i32_3 : i32 to vector<32x64xi32>
    %8 = arith.addi %5, %7 : vector<32x64xi32>
    %9 = arith.cmpi slt, %3, %8 : vector<32x64xi32>
    %10 = arith.andi %6, %9 : vector<32x64xi1>
    %11 = arith.extui %10 : vector<32x64xi1> to vector<32x64xi32>
    %12 = arith.sitofp %11 : vector<32x64xi32> to vector<32x64xf32>
    %13 = tpu.iota {dimensions = array<i32: 0>} : vector<64x32xi32>
    %14 = tpu.iota {dimensions = array<i32: 1>} : vector<64x32xi32>
    %c2_i32_4 = arith.constant 2 : i32
    %15 = vector.broadcast %c2_i32_4 : i32 to vector<64x32xi32>
    %16 = arith.muli %14, %15 : vector<64x32xi32>
    %17 = arith.cmpi sge, %13, %16 : vector<64x32xi32>
    %c2_i32_5 = arith.constant 2 : i32
    %18 = vector.broadcast %c2_i32_5 : i32 to vector<64x32xi32>
    %19 = arith.addi %16, %18 : vector<64x32xi32>
    %20 = arith.cmpi slt, %13, %19 : vector<64x32xi32>
    %21 = arith.andi %17, %20 : vector<64x32xi1>
    %22 = arith.extui %21 : vector<64x32xi1> to vector<64x32xi32>
    %23 = arith.sitofp %22 : vector<64x32xi32> to vector<64x32xf32>
    %cst = arith.constant dense<0.000000e+00> : vector<64xf32>
    %24 = vector.multi_reduction <add>, %1, %cst [1] : vector<64x256xf32> to vector<64xf32>
    %25 = vector.shape_cast %24 : vector<64xf32> to vector<64x1xf32>
    %cst_6 = arith.constant dense<0.000000e+00> : vector<32x1xf32>
    %26 = tpu.matmul %12, %25, %cst_6 {dimension_numbers = #tpu.dot_dimension_numbers<[1], [0], [0], [1], [0, 0, 1, 1], [], []>} : vector<32x64xf32>, vector<64x1xf32>, vector<32x1xf32> -> vector<32x1xf32>
    %cst_7 = arith.constant 0.001953125 : f32
    %27 = vector.broadcast %cst_7 : f32 to vector<32x1xf32>
    %28 = arith.mulf %26, %27 : vector<32x1xf32>
    %cst_8 = arith.constant dense<0.000000e+00> : vector<64x1xf32>
    %29 = tpu.matmul %23, %28, %cst_8 {dimension_numbers = #tpu.dot_dimension_numbers<[1], [0], [0], [1], [0, 0, 1, 1], [], []>} : vector<64x32xf32>, vector<32x1xf32>, vector<64x1xf32> -> vector<64x1xf32>
    %30 = vector.broadcast %29 : vector<64x1xf32> to vector<64x256xf32>
    %31 = arith.subf %1, %30 : vector<64x256xf32>
    %32 = arith.mulf %31, %31 : vector<64x256xf32>
    %cst_9 = arith.constant dense<0.000000e+00> : vector<64xf32>
    %33 = vector.multi_reduction <add>, %32, %cst_9 [1] : vector<64x256xf32> to vector<64xf32>
    %34 = vector.shape_cast %33 : vector<64xf32> to vector<64x1xf32>
    %cst_10 = arith.constant dense<0.000000e+00> : vector<32x1xf32>
    %35 = tpu.matmul %12, %34, %cst_10 {dimension_numbers = #tpu.dot_dimension_numbers<[1], [0], [0], [1], [0, 0, 1, 1], [], []>} : vector<32x64xf32>, vector<64x1xf32>, vector<32x1xf32> -> vector<32x1xf32>
    %cst_11 = arith.constant 0.001953125 : f32
    %36 = vector.broadcast %cst_11 : f32 to vector<32x1xf32>
    %37 = arith.mulf %35, %36 : vector<32x1xf32>
    %cst_12 = arith.constant 9.99999997E-7 : f32
    %38 = vector.broadcast %cst_12 : f32 to vector<32x1xf32>
    %39 = arith.addf %37, %38 : vector<32x1xf32>
    %40 = math.rsqrt %39 : vector<32x1xf32>
    %cst_13 = arith.constant dense<0.000000e+00> : vector<64x1xf32>
    %41 = tpu.matmul %23, %40, %cst_13 {dimension_numbers = #tpu.dot_dimension_numbers<[1], [0], [0], [1], [0, 0, 1, 1], [], []>} : vector<64x32xf32>, vector<32x1xf32>, vector<64x1xf32> -> vector<64x1xf32>
    %c0_14 = arith.constant 0 : index
    %c0_15 = arith.constant 0 : index
    %c0_16 = arith.constant 0 : index
    %42 = vector.load %arg3[%c0_14, %c0_15, %c0_16] : memref<1x64x1xf32, #tpu.memory_space<vmem>>, vector<1x64x1xf32>
    %43 = vector.shape_cast %42 : vector<1x64x1xf32> to vector<64x1xf32>
    %c0_17 = arith.constant 0 : index
    %c0_18 = arith.constant 0 : index
    %c0_19 = arith.constant 0 : index
    %44 = vector.load %arg4[%c0_17, %c0_18, %c0_19] : memref<1x64x1xf32, #tpu.memory_space<vmem>>, vector<1x64x1xf32>
    %45 = vector.shape_cast %44 : vector<1x64x1xf32> to vector<64x1xf32>
    %46 = arith.mulf %43, %41 : vector<64x1xf32>
    %47 = arith.mulf %29, %46 : vector<64x1xf32>
    %48 = arith.subf %45, %47 : vector<64x1xf32>
    %49 = vector.broadcast %46 : vector<64x1xf32> to vector<64x256xf32>
    %50 = arith.mulf %1, %49 : vector<64x256xf32>
    %51 = vector.broadcast %48 : vector<64x1xf32> to vector<64x256xf32>
    %52 = arith.addf %50, %51 : vector<64x256xf32>
    %c0_20 = arith.constant 0 : index
    %c0_21 = arith.constant 0 : index
    %c0_22 = arith.constant 0 : index
    %c0_23 = arith.constant 0 : index
    %53 = vector.load %arg5[%c0_20, %c0_21, %c0_22, %c0_23] : memref<1x1x64x256xf32, #tpu.memory_space<vmem>>, vector<1x1x64x256xf32>
    %54 = vector.shape_cast %53 : vector<1x1x64x256xf32> to vector<64x256xf32>
    %55 = vector.shape_cast %52 : vector<64x256xf32> to vector<1x1x64x256xf32>
    tpu.vector_store %arg5[%c0_20, %c0_21, %c0_22, %c0_23], %55 {strides = array<i32>} : memref<1x1x64x256xf32, #tpu.memory_space<vmem>>, vector<1x1x64x256xf32>,
    return
  }
  func.func @transform_0(%arg0: i32, %arg1: i32) -> (i32, i32, i32, i32) {
    %c0_i32 = arith.constant 0 : i32
    %c0_i32_0 = arith.constant 0 : i32
    %c0_i32_1 = arith.constant 0 : i32
    return %arg1, %arg0, %c0_i32, %c0_i32_0 : i32, i32, i32, i32
  }
  func.func @transform_1(%arg0: i32, %arg1: i32) -> (i32, i32, i32) {
    %c0_i32 = arith.constant 0 : i32
    %c0_i32_0 = arith.constant 0 : i32
    %c0_i32_1 = arith.constant 0 : i32
    return %arg0, %c0_i32, %c0_i32_0 : i32, i32, i32
  }
  func.func @transform_2(%arg0: i32, %arg1: i32) -> (i32, i32, i32) {
    %c0_i32 = arith.constant 0 : i32
    %c0_i32_0 = arith.constant 0 : i32
    %c0_i32_1 = arith.constant 0 : i32
    return %arg0, %c0_i32, %c0_i32_0 : i32, i32, i32
  }
  func.func @transform_3(%arg0: i32, %arg1: i32) -> (i32, i32, i32, i32) {
    %c0_i32 = arith.constant 0 : i32
    %c0_i32_0 = arith.constant 0 : i32
    %c0_i32_1 = arith.constant 0 : i32
    return %arg1, %arg0, %c0_i32, %c0_i32_0 : i32, i32, i32, i32
  }
}

</mosaic_0001>

<bundles_post_ra>
// kernel: tpu_custom_call.1
= control target key start
LH: loop header
LB: loop body
LE: loop exit
PB: predicated region body
PF: predicated region fallthrough
CT: control target
= control target key end

     0   :  { %8 = vsyncpa [#allocation3], 0  ;;  %s1680_s0 = inlined_call_operand.hbm [shape: f32[2,1,64,256], index: 0, kind: input, shape index: {}]   ;;  %s1681_s1 = inlined_call_operand.vmem [shape: f32[1,64,1], index: 1, kind: input, shape index: {}]   ;;  %s1682_s2 = inlined_call_operand.vmem [shape: f32[1,64,1], index: 2, kind: input, shape index: {}]   ;;  %s1683_s3 = inlined_call_operand.hbm [shape: f32[2,1,64,256], index: 3, kind: output, shape index: {}]  }
   0x1   :  { %10 = vsyncpa [#allocation3 + $0x1], 0 }
   0x2   :  { %11 = vsyncpa [#allocation4], 0 }
   0x3   :  { %13 = vsyncpa [#allocation4 + $0x1], 0  ;;  %s1281_s12 = smov 0   ;;  %s1283_s13 = smov 0  }
   0x4   :  { %s1285_s14 = smov 0   ;;  %s1287_s15 = smov 0  }
   0x5   :  { %s1289_s16 = smov 0   ;;  %s1291_s17 = smov 0  }
   0x6 LB: > { %s999_s18 = sadd.s32 4294967295, %s1253_s17   ;;  %s1000_s19 = sadd.s32 4294967294, %s1253_s17   ;;  %s1253_s17 = sphi %s1291_s17, %s19_s17   ;;  %s1249_s16 = sphi %s1289_s16, %s1692_s16   ;;  %s1245_s15 = sphi %s1287_s15, %s1691_s15   ;;  %s1241_s14 = sphi %s1285_s14, %s1690_s14   ;;  %s1237_s13 = sphi %s1283_s13, %s1689_s13   ;;  %s1233_s12 = sphi %s1281_s12, %s1688_s12  }
   0x7   : > { %s28_s20 = sadd.s32 1, %s1249_s16  ;;  %s40_s21 = sadd.s32 1, %s1241_s14 }
   0x8   : > { %p29_p0 = scmp.ge.s32.totalorder %s28_s20, 2  ;;  %p47_p1 = scmp.ne.s32.totalorder %s1241_s14, %s1237_s13 }
   0x9   : > { %p48_p2 = scmp.eq.s32.totalorder %s1253_s17, 0  ;;  %p53_p3 = scmp.ne.s32.totalorder %s1237_s13, %s1233_s12 }
   0xa   : > { %s1694_s20 = smov (%p29_p0, %s28_s20), 0  ;;  %p54_p5 = scmp.eq.s32.totalorder %s999_s18, 0 }
   0xb   : > { %p1322_p4 = por %p48_p2, %p47_p1  ;;  %s35_s23 = ssub.s32 %s1249_s16, %s1694_s20 }
   0xc   : > { %p131_p6 = scmp.eq.s32.totalorder %s999_s18, 1  ;;  %p38_p7 = scmp.eq.s32.totalorder %s35_s23, 0 }
   0xd   : > { %p1328_p8 = por %p54_p5, %p53_p3  ;;  %p137_p10 = scmp.eq.s32.totalorder %s1000_s19, 1 }
   0xe   : > { %p1332_p9 = por %p131_p6, %p47_p1  ;;  %p1004_p12 = scmp.ge.s32.totalorder %s1253_s17, 2 }
   0xf   : > { %s1337_s26 = scalar_select %p38_p7, %s1241_s14, %s40_s21  }
  0x10   : > { %p1339_p11 = por %p137_p10, %p53_p3  ;;  %p1074_p13 = scmp.lt.s32.totalorder %s1253_s17, 2 }
  0x11   : > { %s173_s28 = sand.u32 1, %s1241_s14   ;;  %s1052_s30 = sshll.u32 %s1249_s16, 7 }
  0x12   : > { %s1005_s29 = sshll.u32 %s173_s28, 7  ;;  %s184_s6 = scalar_lea.hbm %s1680_s0, %s1052_s30 }
  0x13   : > { %s177_s7 = scalar_lea.vmem [#allocation2], %s1005_s29  ;;  %s185_s9 = sshll.u32 %s184_s6, 4  ;;  %s186_s9 = int_to_ptr.hbm [resolvable:$true] %s185_s9 }
  0x14   : > { %s187_s8 = sshll.u32 %s177_s7, 4  ;;  %p1067_p0 = pnand %p1074_p13, %p1322_p4  ;;  %s188_s8 = int_to_ptr.vmem [resolvable:$true] %s187_s8 }
  0x15   : > { %p1008_p1 = scmp.ge.s32.totalorder %s1253_s17, 1  ;;  %s174_s10 = scalar_lea.sflag [#allocation3], %s173_s28 }
  0x16   : > { %s1255_s11 = smov 256   ;;  %s1256_s18 = smov 16  }
  0x17   : > { %1069 = dma.hbm_to_vmem [thread:$0]  (!%p1067_p0), %s186_s9, 2048, %s188_s8, %s174_s10, %s1255_s11, %s1255_s11, %s1256_s18  }
  0x18   : > { %p195_p2 = scmp.lt.s32.totalorder %s1253_s17, 3 }
  0x1a   : > { %p196_p3 = pnand %p1008_p1, %p195_p2 }
  0x1b   : > { %s1355_s19 = sand.u32 (!%p196_p3), 1, %s1237_s13  }
  0x1c   : > { %199 = sbr.rel (%p196_p3) target bundleno = 1252 (0x4e4), region = 32  ;;  %s1009_s21 = sshll.u32 (!%p196_p3), %s1355_s19, 7 }
  0x1d   : > { %s202_s23 = scalar_lea.sflag (!%p196_p3), [#allocation3], %s1355_s19  ;;  %s205_s22 = scalar_lea.vmem (!%p196_p3), [#allocation2], %s1009_s21 }
  0x21   : > { %1224 = dma.done.wait (%p1328_p8), %s202_s23, 2048  }
  0x22   : > { %1226 = vsyncadd (%p1328_p8), %s202_s23, 4294965248  ;;  %v1365_v0 = vld [vmem:[%s205_s22 + $0x70] sm:$0xff]  ;;  %v1367_v1 = vld [vmem:[%s205_s22 + $0x78] sm:$0xff]  ;;  %v265_v24 = vlaneseq  ;;  %v1257_v41 = vmov 0.0   ;;  %vm370_vm3 = vcmask 523264   ;;  %s1609_s29 = scalar_lea.vmem [#allocation5], %s1009_s21 }
  0x23   : > { %v1369_v2 = vld [vmem:[%s205_s22 + $0x50] sm:$0xff]  ;;  %v367_v3 = vadd.f32 %v1367_v1, %v1365_v0  ;;  %v1373_v4 = vld [vmem:[%s205_s22 + $0x58] sm:$0xff]  ;;  %v1383_v9 = vld [vmem:[%s205_s22 + $0x60] sm:$0xff]  ;;  %s1053_s21 = sshll.u32 %s1245_s15, 7  ;;  %s879_s6 = sshll.u32 %s1609_s29, 4  ;;  %s880_s6 = int_to_ptr.vmem [resolvable:$true] %s879_s6 }
  0x24   : > { %v361_v5 = vadd.f32 %v1373_v4, %v1369_v2  ;;  %v1377_v6 = vld [vmem:[%s205_s22 + $0x30] sm:$0xff]  ;;  %v1379_v7 = vld [vmem:[%s205_s22 + $0x38] sm:$0xff]  ;;  %v1385_v10 = vld [vmem:[%s205_s22 + $0x68] sm:$0xff]  ;;  %v1413_v27 = vshrl.u32 %v265_v24, 7  ;;  %v271_v32 = vand.u32 127, %v265_v24  ;;  %s878_s5 = scalar_lea.hbm %s1683_s3, %s1053_s21  ;;  %s865_s15 = scalar_lea.sflag [#allocation4], %s1355_s19 }
  0x25   : > { %368 = vadd.xlane.f32.xlu0 %v367_v3  ;;  %v355_v8 = vadd.f32 %v1379_v7, %v1377_v6  ;;  %v1387_v11 = vld [vmem:[%s205_s22 + $0x40] sm:$0xff]  ;;  %v1389_v12 = vld [vmem:[%s205_s22 + $0x48] sm:$0xff]  ;;  %v364_v15 = vadd.f32 %v1385_v10, %v1383_v9  ;;  %v1401_v18 = vld [vmem:[%s205_s22 + $0x10] sm:$0xff]  ;;  %s881_s7 = sshll.u32 %s878_s5, 4  ;;  %s1191_s18 = scalar_lea.hbm %s1683_s3, 256  ;;  %s882_s7 = int_to_ptr.hbm [resolvable:$true] %s881_s7 }
  0x26   : > { %362 = vadd.xlane.f32.xlu1 %v361_v5  ;;  %v1391_v13 = vld [vmem:[%s205_s22 + $0x20] sm:$0xff]  ;;  %v1393_v14 = vld [vmem:[%s205_s22 + $0x28] sm:$0xff]  ;;  %v358_v16 = vadd.f32 %v1389_v12, %v1387_v11  ;;  %v1403_v19 = vld [vmem:[%s205_s22 + $0x18] sm:$0xff]  ;;  %v272_v29 = vmul.u32 2, %v1413_v27  ;;  %v267_v34 = vadd.s32 8, %v1413_v27  ;;  %v268_v39 = vadd.s32 16, %v1413_v27 }
  0x27   : > { %356 = vadd.xlane.f32.xlu2 %v355_v8  ;;  %v352_v17 = vadd.f32 %v1393_v14, %v1391_v13  ;;  %v1405_v20 = vld [vmem:[%s205_s22] sm:$0xff]  ;;  %v1407_v21 = vld [vmem:[%s205_s22 + $0x8] sm:$0xff]  ;;  %v349_v22 = vadd.f32 %v1403_v19, %v1401_v18  ;;  %v269_v45 = vadd.s32 24, %v1413_v27  ;;  %v304_v54 = vmul.u32 2, %v271_v32  ;;  %s1185_s8 = sshra.s32 %s882_s7, 4  ;;  %s1186_s8 = int_to_ptr.hbm [resolvable:$true] %s1185_s8 }
  0x28   : > { %v346_v23 = vadd.f32 %v1407_v21, %v1405_v20  ;;  %v280_v33 = vadd.s32 2, %v272_v29  ;;  %vm276_vm0 = vcmp.ge.s32.totalorder %v271_v32, %v272_v29  ;;  %v273_v35 = vmul.u32 2, %v267_v34  ;;  %s1187_s9 = scalar_lea.hbm %s1186_s8, 128  ;;  %p1192_p7 = scmp.lt.s32.totalorder %s1186_s8, %s1683_s3 }
  0x29   : > { %v274_v43 = vmul.u32 2, %v268_v39  ;;  %v275_v47 = vmul.u32 2, %v269_v45  ;;  %v313_v55 = vadd.s32 2, %v304_v54  ;;  %vm306_vm13 = vcmp.ge.s32.totalorder %v267_v34, %v304_v54  ;;  %p1188_p4 = scmp.ne.s32.totalorder %s1186_s8, %s1187_s9  ;;  %p1193_p8 = scmp.lt.s32.totalorder %s1191_s18, %s1187_s9 }
  0x2a   : > { %vm284_vm1 = vcmp.lt.s32.totalorder %v271_v32, %v280_v33  ;;  %v281_v38 = vadd.s32 2, %v273_v35  ;;  %vm277_vm4 = vcmp.ge.s32.totalorder %v271_v32, %v273_v35  ;;  %v300_v3 = vadd.s32 32, %v1413_v27 }
  0x2b   : > { %vm288_vm2 = vmand %vm276_vm0, %vm284_vm1  ;;  %v282_v44 = vadd.s32 2, %v274_v43  ;;  %vm278_vm7 = vcmp.ge.s32.totalorder %v271_v32, %v274_v43  ;;  %v283_v48 = vadd.s32 2, %v275_v47  ;;  %vm279_vm10 = vcmp.ge.s32.totalorder %v271_v32, %v275_v47  ;;  %p1189_p5 = pnand %p1188_p4, %p1332_p9  ;;  %p1194_p10 = por %p1193_p8, %p1192_p7 }
  0x2c   : > { %v1419_v42 = vsel %vm288_vm2, 1.0, %v1257_v41  ;;  %vm285_vm5 = vcmp.lt.s32.totalorder %v271_v32, %v281_v38  ;;  %vm315_vm14 = vcmp.lt.s32.totalorder %v267_v34, %v313_v55  ;;  %vm416_vm0 = vcmask 261120  }
  0x2d   : > { %365 = vadd.xlane.f32.xlu0 %v364_v15  ;;  %vm289_vm6 = vmand %vm277_vm4, %vm285_vm5  ;;  %vm286_vm8 = vcmp.lt.s32.totalorder %v271_v32, %v282_v44  ;;  %vm287_vm11 = vcmp.lt.s32.totalorder %v271_v32, %v283_v48  ;;  %vm307_vm1 = vcmp.ge.s32.totalorder %v268_v39, %v304_v54  ;;  %vm316_vm2 = vcmp.lt.s32.totalorder %v268_v39, %v313_v55  ;;  %p1190_p6 = pneg %p1189_p5 }
  0x2e   : > { %359 = vadd.xlane.f32.xlu1 %v358_v16  ;;  %v1425_v46 = vsel %vm289_vm6, 1.0, %v1257_v41  ;;  %vm290_vm9 = vmand %vm278_vm7, %vm286_vm8  ;;  %vm308_vm5 = vcmp.ge.s32.totalorder %v269_v45, %v304_v54  ;;  %vm317_vm6 = vcmp.lt.s32.totalorder %v269_v45, %v313_v55  ;;  %vm305_vm7 = vcmp.ge.s32.totalorder %v1413_v27, %v304_v54 }
  0x2f   : > { %353 = vadd.xlane.f32.xlu2 %v352_v17  ;;  %v1430_v49 = vsel %vm290_vm9, 1.0, %v1257_v41  ;;  %vm291_vm12 = vmand %vm279_vm10, %vm287_vm11  ;;  %vm314_vm8 = vcmp.lt.s32.totalorder %v1413_v27, %v313_v55  ;;  %vm309_vm11 = vcmp.ge.s32.totalorder %v300_v3, %v304_v54  ;;  %v301_v8 = vadd.s32 40, %v1413_v27  ;;  %p1195_p13 = pnand %p1194_p10, %p1190_p6 }
  0x30   : > { %v1435_v50 = vsel %vm291_vm12, 1.0, %v1257_v41  ;;  %vm323_vm15 = vmand %vm306_vm13, %vm315_vm14  ;;  %vm318_vm12 = vcmp.lt.s32.totalorder %v300_v3, %v313_v55  ;;  %v302_v16 = vadd.s32 48, %v1413_v27 }
  0x31   : > { %v1440_v61 = vsel %vm323_vm15, 1.0, %v1257_v41  ;;  %vm324_vm4 = vmand %vm307_vm1, %vm316_vm2  ;;  %vm310_vm14 = vcmp.ge.s32.totalorder %v301_v8, %v304_v54  ;;  %vm319_vm15 = vcmp.lt.s32.totalorder %v301_v8, %v313_v55 }
  0x32   : > { %v1445_v62 = vsel %vm324_vm4, 1.0, %v1257_v41  ;;  %vm322_vm9 = vmand %vm305_vm7, %vm314_vm8  ;;  %vm311_vm2 = vcmp.ge.s32.totalorder %v302_v16, %v304_v54  ;;  %vm320_vm4 = vcmp.lt.s32.totalorder %v302_v16, %v313_v55 }
  0x33   : > { %vm325_vm10 = vmand %vm308_vm5, %vm317_vm6  ;;  %v1452_v63 = vsel %vm322_vm9, 1.0, %v1257_v41 }
  0x34   : > { %v1458_v5 = vsel %vm325_vm10, 1.0, %v1257_v41  ;;  %vm326_vm13 = vmand %vm309_vm11, %vm318_vm12 }
  0x35   : > { %350 = vadd.xlane.f32.xlu0 %v349_v22  ;;  %v1464_v15 = vsel %vm326_vm13, 1.0, %v1257_v41  ;;  %vm327_vm1 = vmand %vm310_vm14, %vm319_vm15  ;;  %v303_v22 = vadd.s32 56, %v1413_v27 }
  0x36   : > { %347 = vadd.xlane.f32.xlu1 %v346_v23  ;;  %v1470_v17 = vsel %vm327_vm1, 1.0, %v1257_v41  ;;  %vm328_vm5 = vmand %vm311_vm2, %vm320_vm4 }
  0x37   : > { %v1476_v23 = vsel %vm328_vm5, 1.0, %v1257_v41  ;;  %vm312_vm6 = vcmp.ge.s32.totalorder %v303_v22, %v304_v54  ;;  %vm321_vm7 = vcmp.lt.s32.totalorder %v303_v22, %v313_v55 }
  0x38   : > { %vm329_vm8 = vmand %vm312_vm6, %vm321_vm7 }
  0x39   : > { %v1481_v24 = vsel %vm329_vm8, 1.0, %v1257_v41 }
  0x98   : > { %v369_v25 = vpop.xlane.xlu0 %368 }
  0x99   : > { %391 = vmatpush.msra.mxu0 %v369_v25  ;;  %v363_v26 = vpop.xlane.xlu1 %362  ;;  %v1258_v25 = vmov 0  }
  0x9a   : > { %v357_v28 = vpop.xlane.xlu2 %356  ;;  %1132 = vset.pattern.permute.xlu2 %v1258_v25  ;;  %1131 = vset.pattern.permute.xlu1 %v1258_v25 }
  0x9b   : > { %1130 = vset.pattern.permute.xlu0 %v1258_v25 }
  0xa0   : > { %v366_v30 = vpop.xlane.xlu0 %365 }
  0xa1   : > { %392 = vmatpush.msra.mxu0 %v366_v30  ;;  %v360_v31 = vpop.xlane.xlu1 %359 }
  0xa2   : > { %v354_v36 = vpop.xlane.xlu2 %353 }
  0xa3   : > { %393 = vmatpush.msra.mxu0 %v363_v26 }
  0xa5   : > { %394 = vmatpush.msra.mxu0 %v360_v31 }
  0xa7   : > { %395 = vmatpush.msra.mxu0 %v357_v28 }
  0xa8   : > { %v351_v37 = vpop.xlane.xlu0 %350 }
  0xa9   : > { %396 = vmatpush.msra.mxu0 %v354_v36  ;;  %v348_v40 = vpop.xlane.xlu1 %347 }
  0xab   : > { %397 = vmatpush.msra.mxu0 %v351_v37 }
  0xad   : > { %398 = vmatpush.msra.mxu0 %v348_v40 }
  0xae   : > { %1023 = vmatmul.msk.f32.vlgmr.msra.gmra.mxu0 %vm370_vm3, %v1419_v42 }
  0xb6   : > { %1024 = vmatmul.msk.f32.gmra.mxu0 %vm370_vm3, %v1425_v46 }
  0xbe   : > { %1025 = vmatmul.msk.f32.gmra.mxu0 %vm370_vm3, %v1430_v49 }
  0xc6   : > { %1026 = vmatmul.msk.f32.gmra.mxu0 %vm370_vm3, %v1435_v50 }
 0x12b   : > { %v400_v51 = vpop.f32.mrf.mxu0 }
 0x12c   : > { %v412_v60 = vmul.f32 0.001953125, %v400_v51 }
 0x133   : > { %v403_v52 = vpop.f32.mrf.mxu0 }
 0x134   : > { %v413_v59 = vmul.f32 0.001953125, %v403_v52 }
 0x13b   : > { %v406_v53 = vpop.f32.mrf.mxu0 }
 0x13c   : > { %v414_v58 = vmul.f32 0.001953125, %v406_v53 }
 0x143   : > { %v409_v56 = vpop.f32.mrf.mxu0 }
 0x144   : > { %v415_v57 = vmul.f32 0.001953125, %v409_v56 }
 0x146   : > { %453 = vmatpush.msrb.mxu0 %v415_v57  ;;  %1054 = vmatpush.msra.mxu1 %v415_v57 }
 0x148   : > { %454 = vmatpush.msrb.mxu0 %v414_v58  ;;  %1055 = vmatpush.msra.mxu1 %v414_v58 }
 0x14a   : > { %455 = vmatpush.msrb.mxu0 %v413_v59  ;;  %1056 = vmatpush.msra.mxu1 %v413_v59 }
 0x14c   : > { %456 = vmatpush.msrb.mxu0 %v412_v60  ;;  %1057 = vmatpush.msra.mxu1 %v412_v60 }
 0x14d   : > { %1028 = vmatmul.msk.f32.vlgmr.msra.gmra.mxu1 %vm416_vm0, %v1440_v61  ;;  %1027 = vmatmul.msk.f32.vlgmr.msrb.gmra.mxu0 %vm416_vm0, %v1452_v63 }
 0x155   : > { %1029 = vmatmul.msk.f32.gmra.mxu1 %vm416_vm0, %v1445_v62 }
 0x15d   : > { %1030 = vmatmul.msk.f32.gmra.mxu1 %vm416_vm0, %v1458_v5 }
 0x165   : > { %1031 = vmatmul.msk.f32.gmra.mxu1 %vm416_vm0, %v1464_v15 }
 0x16d   : > { %1032 = vmatmul.msk.f32.gmra.mxu1 %vm416_vm0, %v1470_v17 }
 0x175   : > { %1033 = vmatmul.msk.f32.gmra.mxu1 %vm416_vm0, %v1476_v23 }
 0x17d   : > { %1034 = vmatmul.msk.f32.gmra.mxu1 %vm416_vm0, %v1481_v24 }
 0x1ca   : > { %v1485_v26 = vpop.f32.mrf.mxu1  ;;  %v1501_v32 = vpop.f32.mrf.mxu0 }
 0x1d2   : > { %v1487_v27 = vpop.f32.mrf.mxu1 }
 0x1da   : > { %v1489_v28 = vpop.f32.mrf.mxu1 }
 0x1e2   : > { %v1491_v29 = vpop.f32.mrf.mxu1 }
 0x1e3   : > { %504 = vperm.xlu2 %1132, %v1491_v29  }
 0x1ea   : > { %v1494_v30 = vpop.f32.mrf.mxu1 }
 0x1eb   : > { %509 = vperm.xlu1 %1131, %v1494_v30  }
 0x1f2   : > { %v1497_v31 = vpop.f32.mrf.mxu1 }
 0x1f3   : > { %494 = vperm.xlu1 %1131, %v1487_v27   ;;  %514 = vperm.xlu0 %1130, %v1497_v31  }
 0x1fa   : > { %v1503_v33 = vpop.f32.mrf.mxu1 }
 0x1fb   : > { %519 = vperm.xlu2 %1132, %v1503_v33   ;;  %484 = vperm.xlu1 %1131, %v1501_v32  }
 0x203   : > { %499 = vperm.xlu2 %1132, %v1489_v28  }
 0x20b   : > { %489 = vperm.xlu2 %1132, %v1485_v26  }
 0x23d   : > { %v505_v34 = vpop.permute.xlu2 %504 }
 0x255   : > { %v520_v35 = vpop.permute.xlu2 %519 }
 0x256   : > { %v536_v36 = vsub.f32 %v1365_v0, %v520_v35  ;;  %v537_v37 = vsub.f32 %v1367_v1, %v520_v35 }
 0x258   : > { %v552_v38 = vmul.f32 %v536_v36, %v536_v36  ;;  %v553_v39 = vmul.f32 %v537_v37, %v537_v37  ;;  %v530_v36 = vsub.f32 %v1387_v11, %v505_v34  ;;  %v531_v37 = vsub.f32 %v1389_v12, %v505_v34 }
 0x25a   : > { %v575_v40 = vadd.f32 %v553_v39, %v552_v38 }
 0x25c   : > { %576 = vadd.xlane.f32.xlu0 %v575_v40 }
 0x25d   : > { %v510_v41 = vpop.permute.xlu1 %509  ;;  %v500_v43 = vpop.permute.xlu2 %499 }
 0x25e   : > { %v532_v44 = vsub.f32 %v1369_v2, %v510_v41  ;;  %v533_v45 = vsub.f32 %v1373_v4, %v510_v41  ;;  %v528_v47 = vsub.f32 %v1377_v6, %v500_v43  ;;  %v529_v48 = vsub.f32 %v1379_v7, %v500_v43 }
 0x25f   : > { %v546_v41 = vmul.f32 %v530_v36, %v530_v36  ;;  %v547_v43 = vmul.f32 %v531_v37, %v531_v37 }
 0x260   : > { %v548_v51 = vmul.f32 %v532_v44, %v532_v44  ;;  %v549_v52 = vmul.f32 %v533_v45, %v533_v45  ;;  %v544_v53 = vmul.f32 %v528_v47, %v528_v47  ;;  %v545_v54 = vmul.f32 %v529_v48, %v529_v48 }
 0x262   : > { %v563_v55 = vadd.f32 %v545_v54, %v544_v53  ;;  %v569_v56 = vadd.f32 %v549_v52, %v548_v51  ;;  %v566_v54 = vadd.f32 %v547_v43, %v546_v41 }
 0x264   : > { %564 = vadd.xlane.f32.xlu0 %v563_v55  ;;  %570 = vadd.xlane.f32.xlu1 %v569_v56 }
 0x265   : > { %v495_v57 = vpop.permute.xlu1 %494  ;;  %v515_v58 = vpop.permute.xlu0 %514 }
 0x266   : > { %v526_v59 = vsub.f32 %v1391_v13, %v495_v57  ;;  %v527_v60 = vsub.f32 %v1393_v14, %v495_v57  ;;  %v534_v3 = vsub.f32 %v1383_v9, %v515_v58  ;;  %v535_v8 = vsub.f32 %v1385_v10, %v515_v58  ;;  %v490_v47 = vpop.permute.xlu2 %489 }
 0x267   : > { %v524_v52 = vsub.f32 %v1401_v18, %v490_v47  ;;  %v525_v53 = vsub.f32 %v1403_v19, %v490_v47 }
 0x268   : > { %v542_v16 = vmul.f32 %v526_v59, %v526_v59  ;;  %v543_v22 = vmul.f32 %v527_v60, %v527_v60  ;;  %v550_v25 = vmul.f32 %v534_v3, %v534_v3  ;;  %v551_v35 = vmul.f32 %v535_v8, %v535_v8 }
 0x269   : > { %v540_v55 = vmul.f32 %v524_v52, %v524_v52  ;;  %v541_v56 = vmul.f32 %v525_v53, %v525_v53 }
 0x26a   : > { %v572_v38 = vadd.f32 %v551_v35, %v550_v25  ;;  %v560_v39 = vadd.f32 %v543_v22, %v542_v16 }
 0x26b   : > { %v557_v57 = vadd.f32 %v541_v56, %v540_v55 }
 0x26c   : > { %573 = vadd.xlane.f32.xlu2 %v572_v38  ;;  %561 = vadd.xlane.f32.xlu1 %v560_v39 }
 0x26d   : > { %v485_v40 = vpop.permute.xlu1 %484 }
 0x26e   : > { %v522_v44 = vsub.f32 %v1405_v20, %v485_v40  ;;  %v523_v45 = vsub.f32 %v1407_v21, %v485_v40 }
 0x270   : > { %v538_v48 = vmul.f32 %v522_v44, %v522_v44  ;;  %v539_v51 = vmul.f32 %v523_v45, %v523_v45 }
 0x272   : > { %v554_v34 = vadd.f32 %v539_v51, %v538_v48 }
 0x274   : > { %567 = vadd.xlane.f32.xlu2 %v566_v54  ;;  %555 = vadd.xlane.f32.xlu0 %v554_v34 }
 0x27c   : > { %558 = vadd.xlane.f32.xlu2 %v557_v57 }
 0x2cf   : > { %v577_v58 = vpop.xlane.xlu0 %576 }
 0x2d0   : > { %586 = vmatpush.msra.mxu2 %v577_v58 }
 0x2d7   : > { %v571_v60 = vpop.xlane.xlu1 %570  ;;  %v565_v8 = vpop.xlane.xlu0 %564 }
 0x2df   : > { %v574_v59 = vpop.xlane.xlu2 %573  ;;  %v562_v16 = vpop.xlane.xlu1 %561 }
 0x2e0   : > { %587 = vmatpush.msra.mxu2 %v574_v59 }
 0x2e2   : > { %588 = vmatpush.msra.mxu2 %v571_v60 }
 0x2e7   : > { %v568_v3 = vpop.xlane.xlu2 %567  ;;  %v556_v25 = vpop.xlane.xlu0 %555 }
 0x2e8   : > { %589 = vmatpush.msra.mxu2 %v568_v3 }
 0x2ea   : > { %590 = vmatpush.msra.mxu2 %v565_v8 }
 0x2ec   : > { %591 = vmatpush.msra.mxu2 %v562_v16 }
 0x2ef   : > { %v559_v22 = vpop.xlane.xlu2 %558 }
 0x2f0   : > { %592 = vmatpush.msra.mxu2 %v559_v22 }
 0x2f2   : > { %593 = vmatpush.msra.mxu2 %v556_v25 }
 0x2f3   : > { %1035 = vmatmul.msk.f32.vlgmr.msra.gmra.mxu2 %vm370_vm3, %v1419_v42 }
 0x2fb   : > { %1036 = vmatmul.msk.f32.gmra.mxu2 %vm370_vm3, %v1425_v46 }
 0x303   : > { %1037 = vmatmul.msk.f32.gmra.mxu2 %vm370_vm3, %v1430_v49 }
 0x30b   : > { %1038 = vmatmul.msk.f32.gmra.mxu2 %vm370_vm3, %v1435_v50 }
 0x376   : > { %v595_v35 = vpop.f32.mrf.mxu2 }
 0x377   : > { %v607_v38 = vmul.f32 0.001953125, %v595_v35 }
 0x379   : > { %v611_v43 = vadd.f32 1e-06, %v607_v38 }
 0x37b   : > { %vm621_vm4 = vweird.f32 %v611_v43 }
 0x37e   : > { %v598_v36 = vpop.f32.mrf.mxu2 }
 0x37f   : > { %v608_v37 = vmul.f32 0.001953125, %v598_v36 }
 0x381   : > { %v612_v39 = vadd.f32 1e-06, %v608_v37 }
 0x383   : > { %1133 = vrsqrt.f32 %v612_v39  ;;  %vm631_vm15 = vweird.f32 %v612_v39 }
 0x386   : > { %v601_v40 = vpop.f32.mrf.mxu2 }
 0x387   : > { %v609_v41 = vmul.f32 0.001953125, %v601_v40 }
 0x389   : > { %v613_v44 = vadd.f32 1e-06, %v609_v41  ;;  %v1134_v45 = vpop.eup %1133 }
 0x38a   : > { %v626_v50 = vmul.f32 %v1134_v45, %v612_v39  ;;  %vm632_vm13 = vweird.f32 %v1134_v45 }
 0x38b   : > { %1135 = vrsqrt.f32 %v613_v44  ;;  %vm641_vm12 = vweird.f32 %v613_v44  ;;  %vm633_vm2 = vmor %vm631_vm15, %vm632_vm13 }
 0x38c   : > { %1137 = vrsqrt.f32 %v611_v43  ;;  %v627_v54 = vmul.f32 %v1134_v45, %v626_v50 }
 0x38e   : > { %v604_v42 = vpop.f32.mrf.mxu2  ;;  %v628_v59 = vmul.f32 0.5, %v627_v54  ;;  %v707_v54 = vld [vmem:[%s1682_s2 + $0x18] sm:$0xff] }
 0x38f   : > { %v610_v46 = vmul.f32 0.001953125, %v604_v42 }
 0x390   : > { %v629_v22 = vsub.f32 1.5, %v628_v59 }
 0x391   : > { %v1136_v47 = vpop.eup %1135  ;;  %v614_v49 = vadd.f32 1e-06, %v610_v46 }
 0x392   : > { %v1138_v48 = vpop.eup %1137  ;;  %v636_v51 = vmul.f32 %v1136_v47, %v613_v44  ;;  %vm642_vm10 = vweird.f32 %v1136_v47  ;;  %v630_v38 = vmul.f32 %v1134_v45, %v629_v22  ;;  %v704_v44 = vld [vmem:[%s1682_s2] sm:$0xff] }
 0x393   : > { %1139 = vrsqrt.f32 %v614_v49  ;;  %v616_v52 = vmul.f32 %v1138_v48, %v611_v43  ;;  %vm651_vm9 = vweird.f32 %v614_v49  ;;  %vm643_vm14 = vmor %vm641_vm12, %vm642_vm10  ;;  %vm622_vm1 = vweird.f32 %v1138_v48  ;;  %v705_v43 = vld [vmem:[%s1682_s2 + $0x8] sm:$0xff] }
 0x394   : > { %v637_v53 = vmul.f32 %v1136_v47, %v636_v51  ;;  %v634_v42 = vsel %vm633_vm2, %v1134_v45, %v630_v38  ;;  %vm623_vm5 = vmor %vm621_vm4, %vm622_vm1  ;;  %v706_v51 = vld [vmem:[%s1682_s2 + $0x10] sm:$0xff] }
 0x395   : > { %v617_v55 = vmul.f32 %v1138_v48, %v616_v52 }
 0x396   : > { %v638_v57 = vmul.f32 0.5, %v637_v53 }
 0x397   : > { %v618_v60 = vmul.f32 0.5, %v617_v55  ;;  %v700_v55 = vld [vmem:[%s1681_s1 + $0x20] sm:$0xff] }
 0x398   : > { %v639_v8 = vsub.f32 1.5, %v638_v57 }
 0x399   : > { %v1140_v34 = vpop.eup %1139  ;;  %v619_v25 = vsub.f32 1.5, %v618_v60 }
 0x39a   : > { %v646_v56 = vmul.f32 %v1140_v34, %v614_v49  ;;  %vm652_vm3 = vweird.f32 %v1140_v34  ;;  %v640_v36 = vmul.f32 %v1136_v47, %v639_v8 }
 0x39b   : > { %vm653_vm11 = vmor %vm651_vm9, %vm652_vm3  ;;  %v620_v41 = vmul.f32 %v1138_v48, %v619_v25 }
 0x39c   : > { %v647_v58 = vmul.f32 %v1140_v34, %v646_v56  ;;  %v644_v40 = vsel %vm643_vm14, %v1136_v47, %v640_v36 }
 0x39d   : > { %v624_v46 = vsel %vm623_vm5, %v1138_v48, %v620_v41  ;;  %v711_v41 = vld [vmem:[%s1682_s2 + $0x38] sm:$0xff] }
 0x39e   : > { %v648_v3 = vmul.f32 0.5, %v647_v58  ;;  %v708_v58 = vld [vmem:[%s1682_s2 + $0x20] sm:$0xff] }
 0x3a0   : > { %v649_v16 = vsub.f32 1.5, %v648_v3 }
 0x3a2   : > { %v650_v35 = vmul.f32 %v1140_v34, %v649_v16  ;;  %v702_v16 = vld [vmem:[%s1681_s1 + $0x30] sm:$0xff] }
 0x3a4   : > { %v654_v37 = vsel %vm653_vm11, %v1140_v34, %v650_v35 }
 0x3a5   : > { %667 = vmatpush.msrb.mxu2 %v654_v37  ;;  %1058 = vmatpush.msra.mxu3 %v654_v37  ;;  %v703_v37 = vld [vmem:[%s1681_s1 + $0x38] sm:$0xff] }
 0x3a7   : > { %668 = vmatpush.msrb.mxu2 %v644_v40  ;;  %1059 = vmatpush.msra.mxu3 %v644_v40 }
 0x3a9   : > { %669 = vmatpush.msrb.mxu2 %v634_v42  ;;  %1060 = vmatpush.msra.mxu3 %v634_v42 }
 0x3ab   : > { %670 = vmatpush.msrb.mxu2 %v624_v46  ;;  %1061 = vmatpush.msra.mxu3 %v624_v46 }
 0x3ac   : > { %1039 = vmatmul.msk.f32.vlgmr.msrb.gmra.mxu2 %vm416_vm0, %v1452_v63  ;;  %1040 = vmatmul.msk.f32.vlgmr.msra.gmra.mxu3 %vm416_vm0, %v1440_v61  ;;  %v696_v61 = vld [vmem:[%s1681_s1] sm:$0xff] }
 0x3b4   : > { %1041 = vmatmul.msk.f32.gmra.mxu3 %vm416_vm0, %v1445_v62  ;;  %v697_v62 = vld [vmem:[%s1681_s1 + $0x8] sm:$0xff] }
 0x3bc   : > { %1042 = vmatmul.msk.f32.gmra.mxu3 %vm416_vm0, %v1458_v5 }
 0x3c4   : > { %1043 = vmatmul.msk.f32.gmra.mxu3 %vm416_vm0, %v1464_v15 }
 0x3cc   : > { %1044 = vmatmul.msk.f32.gmra.mxu3 %vm416_vm0, %v1470_v17 }
 0x3d4   : > { %1045 = vmatmul.msk.f32.gmra.mxu3 %vm416_vm0, %v1476_v23 }
 0x3dc   : > { %1046 = vmatmul.msk.f32.gmra.mxu3 %vm416_vm0, %v1481_v24  ;;  %v698_v24 = vld [vmem:[%s1681_s1 + $0x10] sm:$0xff] }
 0x42f   : > { %v672_v63 = vpop.f32.mrf.mxu2  ;;  %v675_v5 = vpop.f32.mrf.mxu3 }
 0x430   : > { %v712_v15 = vmul.f32 %v696_v61, %v672_v63  ;;  %v713_v39 = vmul.f32 %v697_v62, %v675_v5  ;;  %v709_v61 = vld [vmem:[%s1682_s2 + $0x28] sm:$0xff] }
 0x432   : > { %743 = vperm.xlu2 %1132, %v713_v39   ;;  %738 = vperm.xlu1 %1131, %v712_v15   ;;  %v721_v17 = vmul.f32 %v713_v39, %v1485_v26  ;;  %v720_v23 = vmul.f32 %v712_v15, %v1501_v32  ;;  %v699_v32 = vld [vmem:[%s1681_s1 + $0x18] sm:$0xff] }
 0x434   : > { %v729_v49 = vsub.f32 %v705_v43, %v721_v17  ;;  %v728_v48 = vsub.f32 %v704_v44, %v720_v23 }
 0x437   : > { %v678_v45 = vpop.f32.mrf.mxu3 }
 0x438   : > { %v714_v47 = vmul.f32 %v698_v24, %v678_v45 }
 0x43a   : > { %748 = vperm.xlu0 %1130, %v714_v47   ;;  %799 = vperm.xlu1 %1131, %v729_v49   ;;  %v722_v26 = vmul.f32 %v714_v47, %v1487_v27 }
 0x43b   : > { %794 = vperm.xlu2 %1132, %v728_v48  }
 0x43c   : > { %v730_v53 = vsub.f32 %v706_v51, %v722_v26 }
 0x43f   : > { %v681_v50 = vpop.f32.mrf.mxu3 }
 0x440   : > { %v715_v52 = vmul.f32 %v699_v32, %v681_v50 }
 0x442   : > { %v723_v34 = vmul.f32 %v715_v52, %v1489_v28  ;;  %804 = vperm.xlu0 %1130, %v730_v53   ;;  %753 = vperm.xlu1 %1131, %v715_v52   ;;  %v701_v28 = vld [vmem:[%s1681_s1 + $0x28] sm:$0xff] }
 0x444   : > { %v731_v27 = vsub.f32 %v707_v54, %v723_v34 }
 0x446   : > { %809 = vperm.xlu2 %1132, %v731_v27  }
 0x447   : > { %v684_v56 = vpop.f32.mrf.mxu3 }
 0x448   : > { %v716_v57 = vmul.f32 %v700_v55, %v684_v56 }
 0x44a   : > { %v724_v59 = vmul.f32 %v716_v57, %v1491_v29  ;;  %758 = vperm.xlu0 %1130, %v716_v57   ;;  %v710_v29 = vld [vmem:[%s1682_s2 + $0x30] sm:$0xff] }
 0x44c   : > { %v732_v60 = vsub.f32 %v708_v58, %v724_v59 }
 0x44e   : > { %814 = vperm.xlu1 %1131, %v732_v60  }
 0x44f   : > { %v687_v3 = vpop.f32.mrf.mxu3 }
 0x450   : > { %v717_v8 = vmul.f32 %v701_v28, %v687_v3 }
 0x452   : > { %763 = vperm.xlu2 %1132, %v717_v8   ;;  %v725_v46 = vmul.f32 %v717_v8, %v1494_v30 }
 0x454   : > { %v733_v62 = vsub.f32 %v709_v61, %v725_v46 }
 0x457   : > { %v690_v22 = vpop.f32.mrf.mxu3 }
 0x458   : > { %v718_v25 = vmul.f32 %v702_v16, %v690_v22 }
 0x45a   : > { %v726_v35 = vmul.f32 %v718_v25, %v1497_v31  ;;  %768 = vperm.xlu1 %1131, %v718_v25  }
 0x45c   : > { %v734_v36 = vsub.f32 %v710_v29, %v726_v35 }
 0x45e   : > { %824 = vperm.xlu2 %1132, %v734_v36  }
 0x45f   : > { %v693_v38 = vpop.f32.mrf.mxu3 }
 0x460   : > { %v719_v40 = vmul.f32 %v703_v37, %v693_v38 }
 0x462   : > { %v727_v42 = vmul.f32 %v719_v40, %v1503_v33  ;;  %773 = vperm.xlu0 %1130, %v719_v40  }
 0x464   : > { %v735_v31 = vsub.f32 %v711_v41, %v727_v42 }
 0x466   : > { %829 = vperm.xlu1 %1131, %v735_v31  }
 0x46a   : > { %819 = vperm.xlu0 %1130, %v733_v62  }
 0x48c   : > { %v744_v63 = vpop.permute.xlu2 %743 }
 0x48d   : > { %v778_v30 = vmul.f32 %v744_v63, %v1401_v18  ;;  %v779_v24 = vmul.f32 %v744_v63, %v1403_v19 }
 0x495   : > { %v795_v17 = vpop.permute.xlu2 %794 }
 0x4a0   : > { %v810_v51 = vpop.permute.xlu2 %809 }
 0x4a4   : > { %v739_v5 = vpop.permute.xlu1 %738 }
 0x4a5   : > { %v776_v15 = vmul.f32 %v739_v5, %v1405_v20  ;;  %v777_v39 = vmul.f32 %v739_v5, %v1407_v21 }
 0x4a7   : > { %v832_v23 = vadd.f32 %v795_v17, %v776_v15  ;;  %v833_v33 = vadd.f32 %v795_v17, %v777_v39 }
 0x4a9   : > { %848 = vst [vmem:[%s1609_s29] sm:$0xff] %v832_v23 }
 0x4aa   : > { %849 = vst [vmem:[%s1609_s29 + $0x8] sm:$0xff] %v833_v33 }
 0x4ac   : > { %v749_v20 = vpop.permute.xlu0 %748  ;;  %v800_v43 = vpop.permute.xlu1 %799 }
 0x4ad   : > { %v834_v21 = vadd.f32 %v800_v43, %v778_v30  ;;  %v835_v44 = vadd.f32 %v800_v43, %v779_v24  ;;  %v780_v45 = vmul.f32 %v749_v20, %v1391_v13  ;;  %v781_v47 = vmul.f32 %v749_v20, %v1393_v14 }
 0x4af   : > { %850 = vst [vmem:[%s1609_s29 + $0x10] sm:$0xff] %v834_v21 }
 0x4b0   : > { %851 = vst [vmem:[%s1609_s29 + $0x18] sm:$0xff] %v835_v44 }
 0x4b4   : > { %v805_v49 = vpop.permute.xlu0 %804  ;;  %v754_v48 = vpop.permute.xlu1 %753 }
 0x4b5   : > { %v836_v26 = vadd.f32 %v805_v49, %v780_v45  ;;  %v837_v18 = vadd.f32 %v805_v49, %v781_v47  ;;  %v782_v19 = vmul.f32 %v754_v48, %v1377_v6  ;;  %v783_v32 = vmul.f32 %v754_v48, %v1379_v7  ;;  %v764_v7 = vpop.permute.xlu2 %763 }
 0x4b6   : > { %v786_v3 = vmul.f32 %v764_v7, %v1369_v2  ;;  %v787_v8 = vmul.f32 %v764_v7, %v1373_v4 }
 0x4b7   : > { %852 = vst [vmem:[%s1609_s29 + $0x20] sm:$0xff] %v836_v26  ;;  %v838_v50 = vadd.f32 %v810_v51, %v782_v19  ;;  %v839_v52 = vadd.f32 %v810_v51, %v783_v32 }
 0x4b8   : > { %853 = vst [vmem:[%s1609_s29 + $0x28] sm:$0xff] %v837_v18 }
 0x4b9   : > { %854 = vst [vmem:[%s1609_s29 + $0x30] sm:$0xff] %v838_v50 }
 0x4ba   : > { %855 = vst [vmem:[%s1609_s29 + $0x38] sm:$0xff] %v839_v52 }
 0x4bc   : > { %v759_v13 = vpop.permute.xlu0 %758 }
 0x4bd   : > { %v784_v14 = vmul.f32 %v759_v13, %v1387_v11  ;;  %v785_v53 = vmul.f32 %v759_v13, %v1389_v12  ;;  %v825_v57 = vpop.permute.xlu2 %824 }
 0x4c0   : > { %v815_v54 = vpop.permute.xlu1 %814 }
 0x4c1   : > { %v840_v6 = vadd.f32 %v815_v54, %v784_v14  ;;  %v841_v34 = vadd.f32 %v815_v54, %v785_v53 }
 0x4c3   : > { %856 = vst [vmem:[%s1609_s29 + $0x40] sm:$0xff] %v840_v6 }
 0x4c4   : > { %857 = vst [vmem:[%s1609_s29 + $0x48] sm:$0xff] %v841_v34 }
 0x4cc   : > { %v769_v27 = vpop.permute.xlu1 %768 }
 0x4cd   : > { %v788_v55 = vmul.f32 %v769_v27, %v1383_v9  ;;  %v789_v56 = vmul.f32 %v769_v27, %v1385_v10 }
 0x4cf   : > { %v844_v58 = vadd.f32 %v825_v57, %v788_v55  ;;  %v845_v59 = vadd.f32 %v825_v57, %v789_v56 }
 0x4d1   : > { %860 = vst [vmem:[%s1609_s29 + $0x60] sm:$0xff] %v844_v58 }
 0x4d2   : > { %861 = vst [vmem:[%s1609_s29 + $0x68] sm:$0xff] %v845_v59 }
 0x4d4   : > { %v774_v11 = vpop.permute.xlu0 %773 }
 0x4d5   : > { %v790_v12 = vmul.f32 %v774_v11, %v1365_v0  ;;  %v791_v60 = vmul.f32 %v774_v11, %v1367_v1 }
 0x4d8   : > { %v830_v9 = vpop.permute.xlu1 %829 }
 0x4d9   : > { %v846_v10 = vadd.f32 %v830_v9, %v790_v12  ;;  %v847_v28 = vadd.f32 %v830_v9, %v791_v60 }
 0x4db   : > { %862 = vst [vmem:[%s1609_s29 + $0x70] sm:$0xff] %v846_v10 }
 0x4dc   : > { %863 = vst [vmem:[%s1609_s29 + $0x78] sm:$0xff] %v847_v28  ;;  %v820_v0 = vpop.permute.xlu0 %819 }
 0x4dd   : > { %v842_v1 = vadd.f32 %v820_v0, %v786_v3  ;;  %v843_v16 = vadd.f32 %v820_v0, %v787_v8 }
 0x4df   : > { %858 = vst [vmem:[%s1609_s29 + $0x50] sm:$0xff] %v842_v1 }
 0x4e0   : > { %859 = vst [vmem:[%s1609_s29 + $0x58] sm:$0xff] %v843_v16 }
 0x4e1   : > { %1198 = shalt.err (!%p1195_p13)
}
 0x4e2   : > { %s1259_s19 = smov 256   ;;  %s1260_s24 = smov 16  }
 0x4e3   : > { %1064 = dma.vmem_to_hbm [thread:$0]  (%p1332_p9), %s880_s6, 2048, %s882_s7, %s865_s15, %s1259_s19, %s1259_s19, %s1260_s24  }
 0x4e4 PF: > { %s896_s28 = sand.u32 1, %s1233_s12   ;;  %p1071_p0 = pnand %p1004_p12, %p1339_p11 }
 0x4e5   : > { %s897_s29 = scalar_lea.sflag [#allocation4], %s896_s28 }
 0x4e6   : > { %p1072_p1 = pneg %p1071_p0 }
 0x4e8   : > { %1228 = dma.done.wait (%p1072_p1), %s897_s29, 2048  }
 0x4e9   : > { %1230 = vsyncadd (%p1072_p1), %s897_s29, 4294965248  ;;  %s19_s17 = sadd.s32 1, %s1253_s17   ;;  %s1688_s12 = smov %s1237_s13 }
 0x4ea   : > { %p16_p2 = scmp.ge.s32.totalorder %s19_s17, 4   ;;  %s1689_s13 = smov %s1241_s14 }
 0x4eb   : > { %s1690_s14 = smov %s1337_s26  ;;  %s1691_s15 = smov %s1249_s16 }
 0x4ec   : > { %s1692_s16 = smov %s1694_s20  ;;  %18 = sbr.rel (!%p16_p2) target bundleno = 6 (0x6), region = 83 }
 0x4f1   :  { %903 = vsyncpa [#allocation3], 1 }
 0x4f2   :  { %905 = vsyncpa [#allocation3 + $0x1], 1 }
 0x4f3   :  { %906 = vsyncpa [#allocation4], 1 }
 0x4f4   :  { %908 = vsyncpa [#allocation4 + $0x1], 1 }

</bundles_post_ra>
